<compile_context>
chip_gen: v6e
topology: v6e:2x2x1
jax: 0.10.0
libtpu: 0.0.40
codegen_flags: <defaults>
</compile_context>

<pallas_src>
import jax
import jax.numpy as jnp
from jax import lax
from jax.experimental import pallas as pl
from jax.experimental.pallas import tpu as pltpu

LANES = 128
SUBLANES = 8


def _make_sumsq_kernel(tile_rows, inner_steps, rows_valid, need_mask):
    def kernel(x_ref, o_ref, acc_ref):
        k = pl.program_id(1)

        @pl.when(k == 0)
        def _():
            acc_ref[...] = jnp.zeros_like(acc_ref)

        x = x_ref[...].astype(jnp.float32)  # cast in-kernel (free on VPU)

        if need_mask:
            # Only the ragged final grid block can contain garbage rows; zero them.
            s = pl.program_id(0)
            blk = s * inner_steps + k
            row = blk * tile_rows + lax.broadcasted_iota(
                jnp.int32, (tile_rows, LANES), 0
            )
            x = jnp.where(row < rows_valid, x, 0.0)

        sq = x * x
        # Fold the tile's sublane groups into one (8,128) vreg accumulator with
        # pure VPU adds; no per-step XLU reduction, no scalar RMW.
        acc_ref[...] += sq.reshape(tile_rows // SUBLANES, SUBLANES, LANES).sum(axis=0)

        @pl.when(k == inner_steps - 1)
        def _():
            o_ref[0] = acc_ref[...]

    return kernel


def self_attention_regularization(attention_map, *, max_tile_rows=2048):
    """Pallas equivalent of torch.norm(attention_map, p=2)."""
    n = attention_map.size
    flat = jnp.ravel(attention_map)  # keep native dtype; no wrapper upcast

    rows = pl.cdiv(n, LANES)
    rows8 = pl.cdiv(rows, SUBLANES) * SUBLANES
    padded_len = rows8 * LANES
    if padded_len != n:
        # Zero pad only when the element count is not already (8,128)-aligned;
        # zeros contribute nothing to sum(x**2).
        flat = jnp.pad(flat, (0, padded_len - n))
    x2d = flat.reshape(rows8, LANES)

    # Biggest tile that fits comfortably in VMEM on all generations
    # (2048 x 128 x 4 B x 2 pipeline buffers ~= 2 MiB).
    tile_rows = min(max_tile_rows, rows8)          # multiple of 8 by construction
    tiles_total = pl.cdiv(rows8, tile_rows)
    need_mask = (rows8 % tile_rows) != 0           # ragged last grid block

    # Split the row range over 2 slices when it divides evenly so the
    # "parallel" outer axis can use both TensorCores on v7x.
    num_slices = 2 if (tiles_total >= 2 and tiles_total % 2 == 0) else 1
    inner_steps = tiles_total // num_slices

    kernel = _make_sumsq_kernel(tile_rows, inner_steps, rows8, need_mask)

    partials = pl.pallas_call(
        kernel,
        out_shape=jax.ShapeDtypeStruct((num_slices, SUBLANES, LANES), jnp.float32),
        grid_spec=pltpu.PrefetchScalarGridSpec(
            num_scalar_prefetch=0,
            grid=(num_slices, inner_steps),
            in_specs=[
                pl.BlockSpec(
                    (tile_rows, LANES),
                    lambda s, k: (s * inner_steps + k, 0),
                ),
            ],
            out_specs=pl.BlockSpec(
                (1, SUBLANES, LANES),
                lambda s, k: (s, 0, 0),
            ),
            scratch_shapes=[pltpu.VMEM((SUBLANES, LANES), jnp.float32)],
        ),
        compiler_params=pltpu.CompilerParams(
            dimension_semantics=("parallel", "arbitrary"),
        ),
    )(x2d)

    # Single cross-lane reduce + sqrt, once, outside the hot loop.
    return jnp.sqrt(jnp.sum(partials))


if __name__ == "__main__":
    key = jax.random.PRNGKey(0)
    attention_map = jax.random.normal(key, (2, 4, 16, 16), dtype=jnp.float32)

    out = self_attention_regularization(attention_map)
    jax.block_until_ready(out)

    # Reference: Frobenius norm, same as torch.norm(x, p=2).
    ref = jnp.sqrt(jnp.sum(attention_map.astype(jnp.float32) ** 2))
    assert jnp.allclose(out, ref, rtol=1e-6, atol=1e-6), (out, ref)
    print("KERNEL_OK")
</pallas_src>

<mosaic_0001>
module attributes {stable_mosaic.version = 11 : i64} {
  func.func @kernel(%arg0: i32, %arg1: i32, %arg2: memref<16x128xf32, #tpu.memory_space<vmem>>, %arg3: memref<1x8x128xf32, #tpu.memory_space<vmem>>, %arg4: memref<8x128xf32, #tpu.memory_space<vmem>>) attributes {dimension_semantics = [#tpu.dimension_semantics<parallel>, #tpu.dimension_semantics<arbitrary>], iteration_bounds = array<i64: 1, 1>, scalar_prefetch = 0 : i64, scratch_operands = 1 : i64, tpu.core_type = #tpu.core_type<tc>, window_params = [{transform_indices = @transform_0, window_bounds = array<i64: 16, 128>}, {transform_indices = @transform_1, window_bounds = array<i64: 1, 8, 128>}]} {
    %c0_i32 = arith.constant 0 : i32
    %0 = arith.cmpi eq, %arg1, %c0_i32 : i32
    %1 = arith.extui %0 : i1 to i32
    %c0_i32_0 = arith.constant 0 : i32
    %2 = arith.cmpi ne, %1, %c0_i32_0 : i32
    scf.if %2 {
      %cst_8 = arith.constant 0.000000e+00 : f32
      %13 = vector.broadcast %cst_8 : f32 to vector<8x128xf32>
      %c0_9 = arith.constant 0 : index
      %c0_10 = arith.constant 0 : index
      %14 = vector.load %arg4[%c0_9, %c0_10] : memref<8x128xf32, #tpu.memory_space<vmem>>, vector<8x128xf32>
      tpu.vector_store %arg4[%c0_9, %c0_10], %13 {strides = array<i32>} : memref<8x128xf32, #tpu.memory_space<vmem>>, vector<8x128xf32>,
    } else {
    }
    %c0 = arith.constant 0 : index
    %c0_1 = arith.constant 0 : index
    %3 = vector.load %arg2[%c0, %c0_1] : memref<16x128xf32, #tpu.memory_space<vmem>>, vector<16x128xf32>
    %4 = arith.mulf %3, %3 : vector<16x128xf32>
    %c0_2 = arith.constant 0 : index
    %c0_3 = arith.constant 0 : index
    %5 = vector.load %arg4[%c0_2, %c0_3] : memref<8x128xf32, #tpu.memory_space<vmem>>, vector<8x128xf32>
    %6 = vector.shape_cast %4 : vector<16x128xf32> to vector<2x8x128xf32>
    %cst = arith.constant dense<0.000000e+00> : vector<8x128xf32>
    %7 = vector.multi_reduction <add>, %6, %cst [0] : vector<2x8x128xf32> to vector<8x128xf32>
    %8 = arith.addf %5, %7 : vector<8x128xf32>
    %c0_4 = arith.constant 0 : index
    %c0_5 = arith.constant 0 : index
    %9 = vector.load %arg4[%c0_4, %c0_5] : memref<8x128xf32, #tpu.memory_space<vmem>>, vector<8x128xf32>
    tpu.vector_store %arg4[%c0_4, %c0_5], %8 {strides = array<i32>} : memref<8x128xf32, #tpu.memory_space<vmem>>, vector<8x128xf32>,
    %c0_i32_6 = arith.constant 0 : i32
    %10 = arith.cmpi eq, %arg1, %c0_i32_6 : i32
    %11 = arith.extui %10 : i1 to i32
    %c0_i32_7 = arith.constant 0 : i32
    %12 = arith.cmpi ne, %11, %c0_i32_7 : i32
    scf.if %12 {
      %c0_8 = arith.constant 0 : index
      %c0_9 = arith.constant 0 : index
      %13 = vector.load %arg4[%c0_8, %c0_9] : memref<8x128xf32, #tpu.memory_space<vmem>>, vector<8x128xf32>
      %c0_10 = arith.constant 0 : index
      %c0_11 = arith.constant 0 : index
      %c0_12 = arith.constant 0 : index
      %14 = vector.load %arg3[%c0_10, %c0_11, %c0_12] : memref<1x8x128xf32, #tpu.memory_space<vmem>>, vector<1x8x128xf32>
      %15 = vector.shape_cast %14 : vector<1x8x128xf32> to vector<8x128xf32>
      %16 = vector.shape_cast %13 : vector<8x128xf32> to vector<1x8x128xf32>
      tpu.vector_store %arg3[%c0_10, %c0_11, %c0_12], %16 {strides = array<i32>} : memref<1x8x128xf32, #tpu.memory_space<vmem>>, vector<1x8x128xf32>,
    } else {
    }
    return
  }
  func.func @transform_0(%arg0: i32, %arg1: i32) -> (i32, i32) {
    %c1_i32 = arith.constant 1 : i32
    %0 = arith.muli %arg0, %c1_i32 : i32
    %1 = arith.addi %0, %arg1 : i32
    %c0_i32 = arith.constant 0 : i32
    %c0_i32_0 = arith.constant 0 : i32
    return %1, %c0_i32 : i32, i32
  }
  func.func @transform_1(%arg0: i32, %arg1: i32) -> (i32, i32, i32) {
    %c0_i32 = arith.constant 0 : i32
    %c0_i32_0 = arith.constant 0 : i32
    %c0_i32_1 = arith.constant 0 : i32
    return %arg0, %c0_i32, %c0_i32_0 : i32, i32, i32
  }
}

</mosaic_0001>

<bundles_post_ra>
// kernel: tpu_custom_call.1
= control target key start
LH: loop header
LB: loop body
LE: loop exit
PB: predicated region body
PF: predicated region fallthrough
CT: control target
= control target key end

     0   :  { %6 = vsyncpa [#allocation4], 0  ;;  %s130_s0 = inlined_call_operand.hbm [shape: f32[16,128], index: 0, kind: input, shape index: {}]   ;;  %s131_s1 = inlined_call_operand.hbm [shape: f32[1,8,128], index: 1, kind: output, shape index: {}]  }
   0x1   :  { %7 = vsyncpa [#allocation5], 0  ;;  %s110_s6 = smov [#allocation3]  }
   0x2   :  { %s17_s7 = sshll.u32 %s110_s6, 4  ;;  %s18_s7 = int_to_ptr.vmem [resolvable:$true] %s17_s7 }
   0x3   :  { %s74_s8 = scalar_lea.vmem %s18_s7, 256  ;;  %p79_p1 = scmp.lt.s32.totalorder %s18_s7, %s18_s7 }
   0x4   :  { %p75_p0 = scmp.ne.s32.totalorder %s18_s7, %s74_s8  ;;  %p80_p2 = scmp.lt.s32.totalorder %s74_s8, %s74_s8 }
   0x6   :  { %p81_p3 = por %p80_p2, %p79_p1 }
   0x8   :  { %p82_p4 = pnand %p81_p3, %p75_p0 }
   0xa   :  { %85 = shalt.err (!%p82_p4)
}
   0xb   :  { %s111_s9 = smov 128   ;;  %s112_s10 = smov 8  }
   0xc   :  { %23 = dma.hbm_to_vmem [thread:$0]  %s130_s0, 256, %s18_s7, [#allocation4], %s111_s9, %s111_s9, %s112_s10  }
   0xd   :  { %106 = dma.done.wait [#allocation4], 256  }
   0xe   :  { %107 = vsyncadd [#allocation4], 4294967040  ;;  %v34_v0 = vld [vmem:[#allocation3] sm:$0xff]  ;;  %v35_v1 = vld [vmem:[#allocation3 + $0x8] sm:$0xff]  ;;  %s113_s13 = smov [#allocation6]  }
   0xf   :  { %s53_s14 = sshll.u32 %s113_s13, 4  ;;  %v36_v2 = vmul.f32 %v34_v0, %v34_v0  ;;  %v37_v3 = vmul.f32 %v35_v1, %v35_v1  ;;  %s54_s14 = int_to_ptr.vmem [resolvable:$true] %s53_s14 }
  0x10   :  { %s86_s15 = scalar_lea.vmem %s54_s14, 128  ;;  %p91_p6 = scmp.lt.s32.totalorder %s54_s14, %s54_s14 }
  0x11   :  { %v39_v4 = vadd.f32 %v37_v3, %v36_v2  ;;  %p87_p5 = scmp.ne.s32.totalorder %s54_s14, %s86_s15  ;;  %p92_p7 = scmp.lt.s32.totalorder %s86_s15, %s86_s15 }
  0x13   :  { %46 = vst [vmem:[#allocation6] sm:$0xff] %v39_v4  ;;  %p93_p8 = por %p92_p7, %p91_p6 }
  0x15   :  { %p94_p9 = pnand %p93_p8, %p87_p5 }
  0x17   :  { %97 = shalt.err (!%p94_p9)
}
  0x18   :  { %56 = dma.vmem_to_hbm [thread:$0]  %s54_s14, 128, %s131_s1, [#allocation5]  }
  0x19   :  { %108 = dma.done.wait [#allocation5], 128  }
  0x1a   :  { %109 = vsyncadd [#allocation5], 4294967168 }
  0x1b   :  { %60 = vsyncpa [#allocation4], 1 }
  0x1c   :  { %61 = vsyncpa [#allocation5], 1 }

</bundles_post_ra>
